<compile_context>
chip_gen: v6e
topology: v6e:2x2x1
jax: 0.10.0
libtpu: 0.0.40
codegen_flags: <defaults>
</compile_context>

<pallas_src>
import functools

import jax
import jax.numpy as jnp
from jax import lax
from jax.experimental import pallas as pl
from jax.experimental.pallas import tpu as pltpu

LANE = 128
SUBLANE = 8
# Pair-table mode only while k * n_pad^2 rows stay tiny (table ~ k*n^2*nhid_pad).
_PAIR_TABLE_MAX_ROWS = 4096


def _round_up(x, m):
    return (x + m - 1) // m * m


# ---------------------------------------------------------------------------
# Kernels
# ---------------------------------------------------------------------------
def _pair_table_kernel(idx_ref, pair_tab_ref, b_ref, o_ref, *, k, n_pad):
    """Fully fused path for tiny vocabularies.

    idx_ref      : (TB, 2k) int32, laid out [cnt_0..cnt_{k-1} | val_0..val_{k-1}]
    pair_tab_ref : (k*n_pad^2, nhid_pad) f32,
                   row i*n_pad^2 + c*n_pad + v = tanh(cnt[c]*val[v]) @ W_i
    b_ref        : (1, nhid_pad) f32
    o_ref        : (TB, nhid_pad) f32   lane-dense output tile
    """
    tb = idx_ref.shape[0]
    rows = pair_tab_ref.shape[0]
    n_pad2 = n_pad * n_pad

    idx = idx_ref[...]                                        # (TB, 2k) int32
    iota_r = lax.broadcasted_iota(jnp.int32, (tb, rows), 1)   # (TB, k*n_pad^2)

    # Multi-hot over the k disjoint per-item segments: exactly one hit / item.
    onehot = jnp.zeros((tb, rows), jnp.float32)
    for i in range(k):                                        # k is tiny & static
        ci = idx[:, i:i + 1]                                  # (TB, 1) cnt index
        vi = idx[:, k + i:k + i + 1]                          # (TB, 1) val index
        gidx = i * n_pad2 + ci * n_pad + vi                   # global pair row
        onehot = onehot + (iota_r == gidx).astype(jnp.float32)

    # One lane-dense MXU matmul: K = k*n_pad^2, N = nhid_pad.
    out = jnp.dot(onehot, pair_tab_ref[...], preferred_element_type=jnp.float32)
    o_ref[...] = (out + b_ref[...]).astype(o_ref.dtype)


def _blockdiag_kernel(idx_ref, cnt_blk_ref, val_blk_ref, w_ref, b_ref, o_ref,
                      *, k, n_pad):
    """General fallback: block-diagonal embedding gathers + one Linear matmul.

    idx_ref     : (TB, 2k) int32, [all cnt | all val]
    cnt_blk_ref : (k*n_pad, k*nembed) f32 block-diagonal count table
    val_blk_ref : (k*n_pad, k*nembed) f32 block-diagonal value table
    w_ref       : (k*nembed, nhid_pad) f32 pre-transposed, lane-padded weight
    b_ref       : (1, nhid_pad) f32
    o_ref       : (TB, nhid_pad) f32
    """
    tb = idx_ref.shape[0]
    rows = cnt_blk_ref.shape[0]                               # k * n_pad

    idx = idx_ref[...]
    iota_r = lax.broadcasted_iota(jnp.int32, (tb, rows), 1)

    oh_c = jnp.zeros((tb, rows), jnp.float32)
    oh_v = jnp.zeros((tb, rows), jnp.float32)
    for i in range(k):
        ci = idx[:, i:i + 1]
        vi = idx[:, k + i:k + i + 1]
        oh_c = oh_c + (iota_r == i * n_pad + ci).astype(jnp.float32)
        oh_v = oh_v + (iota_r == i * n_pad + vi).astype(jnp.float32)

    # Exact one-hot gathers of all k embedding rows at once (block-diagonal
    # table -> item i's embedding lands in lanes [i*nembed, (i+1)*nembed)).
    cemb = jnp.dot(oh_c, cnt_blk_ref[...], preferred_element_type=jnp.float32)
    vemb = jnp.dot(oh_v, val_blk_ref[...], preferred_element_type=jnp.float32)
    h = jnp.tanh(cemb * vemb)                                 # (TB, k*nembed)

    # Single matmul over the full K = k*nembed: matches the reference
    # (batch, k*nembed) @ (k*nembed, nhid) reduction order.
    out = jnp.dot(h, w_ref[...], preferred_element_type=jnp.float32)
    o_ref[...] = (out + b_ref[...]).astype(o_ref.dtype)


# ---------------------------------------------------------------------------
# One-time parameter preparation (per model, not per forward call)
# ---------------------------------------------------------------------------
def prepare_params(cnt_table, val_table, w, b, *,
                   pair_table_max_rows=_PAIR_TABLE_MAX_ROWS):
    n, nembed = cnt_table.shape
    nhid, d = w.shape
    k = d // nembed
    n_pad = _round_up(n, SUBLANE)
    nhid_pad = _round_up(nhid, LANE)

    cnt_table = cnt_table.astype(jnp.float32)
    val_table = val_table.astype(jnp.float32)
    # Pre-transposed, lane-padded Linear weight / bias (done once, not per call).
    w_t = jnp.zeros((d, nhid_pad), jnp.float32).at[:, :nhid].set(
        w.T.astype(jnp.float32))
    b_p = jnp.zeros((1, nhid_pad), jnp.float32).at[0, :nhid].set(
        b.astype(jnp.float32))

    pair_rows = k * n_pad * n_pad
    if pair_rows <= pair_table_max_rows:
        # Fold gathers + mul + tanh + Linear into one table:
        #   P[i, c, v, :] = tanh(cnt[c] * val[v]) @ W_i
        # Padded c/v rows are zero -> tanh(0)=0 -> zero table rows.
        cnt_p = jnp.pad(cnt_table, ((0, n_pad - n), (0, 0)))       # (n_pad, e)
        val_p = jnp.pad(val_table, ((0, n_pad - n), (0, 0)))
        h_pairs = jnp.tanh(cnt_p[:, None, :] * val_p[None, :, :])  # (n_pad,n_pad,e)
        w_items = w_t.reshape(k, nembed, nhid_pad)                 # (k,e,nhid_pad)
        pair_tab = jnp.einsum('cve,keh->kcvh', h_pairs, w_items)
        pair_tab = pair_tab.reshape(pair_rows, nhid_pad)
        return dict(mode="pair", k=k, n_pad=n_pad, nhid=nhid, nhid_pad=nhid_pad,
                    pair_tab=pair_tab, bias=b_p)

    # Fallback: block-diagonal embedding tables.
    rows = k * n_pad
    cnt_blk = jnp.zeros((rows, d), jnp.float32)
    val_blk = jnp.zeros((rows, d), jnp.float32)
    for i in range(k):
        cnt_blk = cnt_blk.at[i * n_pad:i * n_pad + n,
                             i * nembed:(i + 1) * nembed].set(cnt_table)
        val_blk = val_blk.at[i * n_pad:i * n_pad + n,
                             i * nembed:(i + 1) * nembed].set(val_table)
    return dict(mode="blockdiag", k=k, n_pad=n_pad, nhid=nhid, nhid_pad=nhid_pad,
                cnt_blk=cnt_blk, val_blk=val_blk, w=w_t, bias=b_p)


# ---------------------------------------------------------------------------
# Forward wrapper
# ---------------------------------------------------------------------------
def mlp_context_encoder(ctx, params, *, block_batch=512):
    """ctx: (2*k, batch) int indices.  Returns (1, batch, nhid) float32."""
    k = params["k"]
    nhid = params["nhid"]
    nhid_pad = params["nhid_pad"]
    two_k, batch = ctx.shape
    assert two_k == 2 * k

    # Glue: de-interleave cnt/val once -> (batch, 2k) laid out [all cnt | all val]
    # so the kernel takes contiguous lane slices instead of stride-2 slices.
    idx = jnp.concatenate([ctx[0::2].T, ctx[1::2].T], axis=1).astype(jnp.int32)

    # Batch tile: big enough to amortize the ~0.35 us/step overhead, but keep
    # >= 2 grid steps whenever the batch allows so v7x can shard the "parallel"
    # axis across both TensorCores.
    batch_su = _round_up(batch, SUBLANE)
    half = _round_up((batch_su + 1) // 2, SUBLANE)
    tb = max(SUBLANE, min(block_batch, half))
    batch_pad = _round_up(batch, tb)
    if batch_pad != batch:
        # Index 0 is a valid table row; padded output rows are sliced off below.
        idx = jnp.pad(idx, ((0, batch_pad - batch), (0, 0)))
    grid = (batch_pad // tb,)

    if params["mode"] == "pair":
        kernel = functools.partial(_pair_table_kernel, k=k, n_pad=params["n_pad"])
        operands = (idx, params["pair_tab"], params["bias"])
        in_specs = [
            pl.BlockSpec((tb, 2 * k), lambda i: (i, 0)),             # index tile
            pl.BlockSpec(params["pair_tab"].shape, lambda i: (0, 0)),  # pair table
            pl.BlockSpec((1, nhid_pad), lambda i: (0, 0)),           # bias
        ]
    else:
        kernel = functools.partial(_blockdiag_kernel, k=k, n_pad=params["n_pad"])
        operands = (idx, params["cnt_blk"], params["val_blk"], params["w"],
                    params["bias"])
        in_specs = [
            pl.BlockSpec((tb, 2 * k), lambda i: (i, 0)),
            pl.BlockSpec(params["cnt_blk"].shape, lambda i: (0, 0)),
            pl.BlockSpec(params["val_blk"].shape, lambda i: (0, 0)),
            pl.BlockSpec(params["w"].shape, lambda i: (0, 0)),
            pl.BlockSpec((1, nhid_pad), lambda i: (0, 0)),
        ]

    out = pl.pallas_call(
        kernel,
        out_shape=jax.ShapeDtypeStruct((batch_pad, nhid_pad), jnp.float32),
        grid_spec=pltpu.PrefetchScalarGridSpec(
            num_scalar_prefetch=0,
            grid=grid,
            in_specs=in_specs,
            out_specs=pl.BlockSpec((tb, nhid_pad), lambda i: (i, 0)),
        ),
        compiler_params=pltpu.CompilerParams(
            dimension_semantics=("parallel",),   # shard batch tiles across TCs
        ),
    )(*operands)

    return out[:batch, :nhid][None]              # unsqueeze(0) -> (1, batch, nhid)


# ---------------------------------------------------------------------------
# Pure-JAX reference (mirrors the PyTorch forward)
# ---------------------------------------------------------------------------
def _reference(ctx, cnt_table, val_table, w, b):
    batch = ctx.shape[1]
    cnt_emb = cnt_table[ctx[0::2]]
    val_emb = val_table[ctx[1::2]]
    h = cnt_emb * val_emb
    h = jnp.transpose(h, (1, 0, 2)).reshape(batch, -1)
    return (jnp.tanh(h) @ w.T + b)[None]


if __name__ == "__main__":
    # Module hyperparameters (small, consistent with the forward pass).
    n = 10          # embedding vocab size
    k = 3           # number of item types (ctx has 2*k rows)
    nembed = 16
    nhid = 32
    batch = 20
    init_range = 0.1

    key = jax.random.PRNGKey(0)
    k1, k2, k3, k4 = jax.random.split(key, 4)

    # Deterministic parameter init mirroring the PyTorch __init__:
    cnt_table = jax.random.uniform(k1, (n, nembed), jnp.float32,
                                   minval=-init_range, maxval=init_range)
    val_table = jax.random.uniform(k2, (n, nembed), jnp.float32,
                                   minval=-init_range, maxval=init_range)
    w = jax.random.uniform(k3, (nhid, k * nembed), jnp.float32,
                           minval=-init_range, maxval=init_range)   # Linear weight
    b = jnp.zeros((nhid,), jnp.float32)                             # Linear bias (fill_(0))

    # Input: ctx of shape (2*k, batch) with integer indices in [0, n).
    ctx = jax.random.randint(k4, (2 * k, batch), 0, n, dtype=jnp.int32)

    ref = _reference(ctx, cnt_table, val_table, w, b)

    # Path A: pair-table kernel (tiny n -> fully fused single MXU matmul).
    params_pair = prepare_params(cnt_table, val_table, w, b)
    assert params_pair["mode"] == "pair"
    out_pair = jax.block_until_ready(mlp_context_encoder(ctx, params_pair))
    assert out_pair.shape == (1, batch, nhid)
    assert jnp.allclose(out_pair, ref, atol=1e-5, rtol=1e-5)

    # Path B: block-diagonal fallback (the path larger-n configs would take).
    params_bd = prepare_params(cnt_table, val_table, w, b, pair_table_max_rows=0)
    assert params_bd["mode"] == "blockdiag"
    out_bd = jax.block_until_ready(mlp_context_encoder(ctx, params_bd))
    assert out_bd.shape == (1, batch, nhid)
    assert jnp.allclose(out_bd, ref, atol=1e-5, rtol=1e-5)

    print("KERNEL_OK")
</pallas_src>

<mosaic_0001>
module attributes {stable_mosaic.version = 11 : i64} {
  func.func @_pair_table_kernel(%arg0: i32, %arg1: memref<16x6xi32, #tpu.memory_space<vmem>>, %arg2: memref<768x128xf32, #tpu.memory_space<vmem>>, %arg3: memref<1x128xf32, #tpu.memory_space<vmem>>, %arg4: memref<16x128xf32, #tpu.memory_space<vmem>>) attributes {dimension_semantics = [#tpu.dimension_semantics<parallel>], iteration_bounds = array<i64: 2>, scalar_prefetch = 0 : i64, scratch_operands = 0 : i64, tpu.core_type = #tpu.core_type<tc>, window_params = [{transform_indices = @transform_0, window_bounds = array<i64: 16, 6>}, {pipeline_mode = #tpu.pipeline_mode<synchronous>, transform_indices = @transform_1, window_bounds = array<i64: 768, 128>}, {pipeline_mode = #tpu.pipeline_mode<synchronous>, transform_indices = @transform_2, window_bounds = array<i64: 1, 128>}, {transform_indices = @transform_3, window_bounds = array<i64: 16, 128>}]} {
    %c0 = arith.constant 0 : index
    %c0_0 = arith.constant 0 : index
    %0 = vector.load %arg1[%c0, %c0_0] : memref<16x6xi32, #tpu.memory_space<vmem>>, vector<16x6xi32>
    %1 = tpu.iota {dimensions = array<i32: 1>} : vector<16x768xi32>
    %cst = arith.constant 0.000000e+00 : f32
    %2 = vector.broadcast %cst : f32 to vector<16x768xf32>
    %3 = vector.extract_strided_slice %0 {offsets = [0, 0], sizes = [16, 1], strides = [1, 1]} : vector<16x6xi32> to vector<16x1xi32>
    %4 = vector.extract_strided_slice %0 {offsets = [0, 3], sizes = [16, 1], strides = [1, 1]} : vector<16x6xi32> to vector<16x1xi32>
    %c16_i32 = arith.constant 16 : i32
    %5 = vector.broadcast %c16_i32 : i32 to vector<16x1xi32>
    %6 = arith.muli %3, %5 : vector<16x1xi32>
    %c0_i32 = arith.constant 0 : i32
    %7 = vector.broadcast %c0_i32 : i32 to vector<16x1xi32>
    %8 = arith.addi %7, %6 : vector<16x1xi32>
    %9 = arith.addi %8, %4 : vector<16x1xi32>
    %10 = vector.broadcast %9 : vector<16x1xi32> to vector<16x768xi32>
    %11 = arith.cmpi eq, %1, %10 : vector<16x768xi32>
    %12 = arith.extui %11 : vector<16x768xi1> to vector<16x768xi32>
    %13 = arith.sitofp %12 : vector<16x768xi32> to vector<16x768xf32>
    %14 = arith.addf %2, %13 : vector<16x768xf32>
    %15 = vector.extract_strided_slice %0 {offsets = [0, 1], sizes = [16, 1], strides = [1, 1]} : vector<16x6xi32> to vector<16x1xi32>
    %16 = vector.extract_strided_slice %0 {offsets = [0, 4], sizes = [16, 1], strides = [1, 1]} : vector<16x6xi32> to vector<16x1xi32>
    %c16_i32_1 = arith.constant 16 : i32
    %17 = vector.broadcast %c16_i32_1 : i32 to vector<16x1xi32>
    %18 = arith.muli %15, %17 : vector<16x1xi32>
    %c256_i32 = arith.constant 256 : i32
    %19 = vector.broadcast %c256_i32 : i32 to vector<16x1xi32>
    %20 = arith.addi %19, %18 : vector<16x1xi32>
    %21 = arith.addi %20, %16 : vector<16x1xi32>
    %22 = vector.broadcast %21 : vector<16x1xi32> to vector<16x768xi32>
    %23 = arith.cmpi eq, %1, %22 : vector<16x768xi32>
    %24 = arith.extui %23 : vector<16x768xi1> to vector<16x768xi32>
    %25 = arith.sitofp %24 : vector<16x768xi32> to vector<16x768xf32>
    %26 = arith.addf %14, %25 : vector<16x768xf32>
    %27 = vector.extract_strided_slice %0 {offsets = [0, 2], sizes = [16, 1], strides = [1, 1]} : vector<16x6xi32> to vector<16x1xi32>
    %28 = vector.extract_strided_slice %0 {offsets = [0, 5], sizes = [16, 1], strides = [1, 1]} : vector<16x6xi32> to vector<16x1xi32>
    %c16_i32_2 = arith.constant 16 : i32
    %29 = vector.broadcast %c16_i32_2 : i32 to vector<16x1xi32>
    %30 = arith.muli %27, %29 : vector<16x1xi32>
    %c512_i32 = arith.constant 512 : i32
    %31 = vector.broadcast %c512_i32 : i32 to vector<16x1xi32>
    %32 = arith.addi %31, %30 : vector<16x1xi32>
    %33 = arith.addi %32, %28 : vector<16x1xi32>
    %34 = vector.broadcast %33 : vector<16x1xi32> to vector<16x768xi32>
    %35 = arith.cmpi eq, %1, %34 : vector<16x768xi32>
    %36 = arith.extui %35 : vector<16x768xi1> to vector<16x768xi32>
    %37 = arith.sitofp %36 : vector<16x768xi32> to vector<16x768xf32>
    %38 = arith.addf %26, %37 : vector<16x768xf32>
    %c0_3 = arith.constant 0 : index
    %c0_4 = arith.constant 0 : index
    %39 = vector.load %arg2[%c0_3, %c0_4] : memref<768x128xf32, #tpu.memory_space<vmem>>, vector<768x128xf32>
    %cst_5 = arith.constant dense<0.000000e+00> : vector<16x128xf32>
    %40 = tpu.matmul %38, %39, %cst_5 {dimension_numbers = #tpu.dot_dimension_numbers<[1], [0], [0], [1], [0, 0, 1, 1], [], []>} : vector<16x768xf32>, vector<768x128xf32>, vector<16x128xf32> -> vector<16x128xf32>
    %c0_6 = arith.constant 0 : index
    %c0_7 = arith.constant 0 : index
    %41 = vector.load %arg3[%c0_6, %c0_7] : memref<1x128xf32, #tpu.memory_space<vmem>>, vector<1x128xf32>
    %42 = vector.broadcast %41 : vector<1x128xf32> to vector<16x128xf32>
    %43 = arith.addf %40, %42 : vector<16x128xf32>
    %c0_8 = arith.constant 0 : index
    %c0_9 = arith.constant 0 : index
    %44 = vector.load %arg4[%c0_8, %c0_9] : memref<16x128xf32, #tpu.memory_space<vmem>>, vector<16x128xf32>
    tpu.vector_store %arg4[%c0_8, %c0_9], %43 {strides = array<i32>} : memref<16x128xf32, #tpu.memory_space<vmem>>, vector<16x128xf32>,
    return
  }
  func.func @transform_0(%arg0: i32) -> (i32, i32) {
    %c0_i32 = arith.constant 0 : i32
    %c0_i32_0 = arith.constant 0 : i32
    return %arg0, %c0_i32 : i32, i32
  }
  func.func @transform_1(%arg0: i32) -> (i32, i32) {
    %c0_i32 = arith.constant 0 : i32
    %c0_i32_0 = arith.constant 0 : i32
    %c0_i32_1 = arith.constant 0 : i32
    return %c0_i32, %c0_i32_0 : i32, i32
  }
  func.func @transform_2(%arg0: i32) -> (i32, i32) {
    %c0_i32 = arith.constant 0 : i32
    %c0_i32_0 = arith.constant 0 : i32
    %c0_i32_1 = arith.constant 0 : i32
    return %c0_i32, %c0_i32_0 : i32, i32
  }
  func.func @transform_3(%arg0: i32) -> (i32, i32) {
    %c0_i32 = arith.constant 0 : i32
    %c0_i32_0 = arith.constant 0 : i32
    return %arg0, %c0_i32 : i32, i32
  }
}

</mosaic_0001>

<bundles_post_ra>
// kernel: tpu_custom_call.1
= control target key start
LH: loop header
LB: loop body
LE: loop exit
PB: predicated region body
PF: predicated region fallthrough
CT: control target
= control target key end

     0   :  { %8 = vsyncpa [#allocation3], 0  ;;  %s1464_s0 = inlined_call_operand.vmem [shape: s32[32,6], index: 0, kind: input, shape index: {}]   ;;  %s1465_s1 = inlined_call_operand.hbm [shape: f32[768,128], index: 1, kind: input, shape index: {}]   ;;  %s1466_s2 = inlined_call_operand.vmem [shape: f32[1,128], index: 2, kind: input, shape index: {}]   ;;  %s1467_s3 = inlined_call_operand.hbm [shape: f32[32,128], index: 3, kind: output, shape index: {}]  }
   0x1   :  { %9 = vsyncpa [#allocation4], 0 }
   0x2   :  { %11 = vsyncpa [#allocation4 + $0x1], 0  ;;  %s1177_s12 = smov 0   ;;  %s1179_s13 = smov 0  }
   0x3   :  { %s1181_s14 = smov 0   ;;  %s1183_s15 = smov 0  }
   0x4 LB: > { %s1198_s16 = sadd.s32 4294967295, %s1144_s15   ;;  %s792_s17 = sadd.s32 4294967294, %s1144_s15   ;;  %s1144_s15 = sphi %s1183_s15, %s1475_s15   ;;  %s1140_s14 = sphi %s1181_s14, %s1474_s14   ;;  %s1136_s13 = sphi %s1179_s13, %s1473_s13   ;;  %s1132_s12 = sphi %s1177_s12, %s1472_s12  }
   0x5   : > { %s1202_s18 = sadd.s32 1, %s1144_s15   ;;  %s92_s19 = sadd.s32 1, %s1140_s14 }
   0x6   : > { %s89_s20 = ssub.s32 %s1144_s15, %s1202_s18  ;;  %p102_p0 = scmp.ne.s32.totalorder %s1140_s14, %s1136_s13 }
   0x7   : > { %p90_p1 = scmp.eq.s32.totalorder %s89_s20, 0  ;;  %p103_p2 = scmp.eq.s32.totalorder %s1198_s16, 1 }
   0x8   : > { %p108_p3 = scmp.ne.s32.totalorder %s1136_s13, %s1132_s12  ;;  %p109_p4 = scmp.eq.s32.totalorder %s792_s17, 1 }
   0x9   : > { %s1213_s21 = scalar_select %p90_p1, %s1140_s14, %s92_s19  }
   0xa   : > { %p1215_p5 = por %p103_p2, %p102_p0  ;;  %p1219_p6 = por %p109_p4, %p108_p3 }
   0xb   : > { %p793_p7 = scmp.ge.s32.totalorder %s1144_s15, 1  ;;  %p116_p8 = scmp.lt.s32.totalorder %s1144_s15, 3 }
   0xc   : > { %s1469_s23 = scalar_select %p1219_p6, 1, 0 }
   0xd   : > { %p1004_p9 = scmp.eq.s32.totalorder %s1198_s16, 0  ;;  %p1226_p10 = pnand %p793_p7, %p116_p8 }
   0xe   : > { %s1146_s25 = smov [#allocation2]  }
   0xf   : > { %s128_s26 = sshll.u32 %s1146_s25, 4  ;;  %p996_p11 = pneg %p1226_p10  ;;  %s129_s26 = int_to_ptr.vmem [resolvable:$true] %s128_s26 }
  0x10   : > { %s1065_s27 = scalar_lea.vmem %s129_s26, 12288  ;;  %p1073_p3 = scmp.lt.s32.totalorder %s129_s26, %s129_s26 }
  0x11   : > { %p997_p12 = pnand %p1004_p9, %p996_p11  ;;  %p1066_p0 = scmp.ne.s32.totalorder %s129_s26, %s1065_s27 }
  0x12   : > { %p1074_p4 = scmp.lt.s32.totalorder %s1065_s27, %s1065_s27 }
  0x13   : > { %p1056_p13 = pneg %p997_p12 }
  0x14   : > { %p1075_p6 = por %p1074_p4, %p1073_p3 }
  0x15   : > { %p1068_p1 = pnand %p1066_p0, %p1056_p13 }
  0x17   : > { %p1069_p2 = pneg %p1068_p1 }
  0x19   : > { %p1076_p7 = pnand %p1075_p6, %p1069_p2 }
  0x1b   : > { %1079 = shalt.err (!%p1076_p7)
}
  0x1c   : > { %s1147_s28 = smov 128   ;;  %s1148_s29 = smov 8  }
  0x1d   : > { %999 = dma.hbm_to_vmem [thread:$0]  (!%p997_p12), %s1465_s1, 12288, %s129_s26, [#allocation3], %s1147_s28, %s1147_s28, %s1148_s29  }
  0x1e   : > { %156 = sbr.rel (%p1226_p10) target bundleno = 544 (0x220), region = 32 }
  0x23   : > { %1123 = dma.done.wait (%p1004_p9), [#allocation3], 12288  }
  0x24   : > { %1125 = vsyncadd (%p1004_p9), [#allocation3], 4294955008  ;;  %s799_s5 = sshll.u32 %s1198_s16, 1  ;;  %v1149_v0 = vmov 2   ;;  %v1150_v1 = vmov 0   ;;  %s1151_s10 = smov 125  }
  0x25   : > { %p181_p8 = scmp.lt.s32.totalorder %s799_s5, 3  ;;  %1051 = vset.pattern.permute.xlu0 %v1149_v0  ;;  %1049 = vset.pattern.permute.xlu1 %v1150_v1  ;;  %v405_v4 = vld [vmem:[#allocation2 + $0xf8] sm:$0xff]  ;;  %v404_v8 = vld [vmem:[#allocation2 + $0xf0] sm:$0xff]  ;;  %v403_v12 = vld [vmem:[#allocation2 + $0xe8] sm:$0xff]  ;;  %s177_s11 = sand.u32 1, %s1136_s13  }
  0x26   : > { %v437_v5 = vld [vmem:[#allocation2 + $0x1f8] sm:$0xff]  ;;  %844 = vmatprep.subr.mxu0 %v405_v4  ;;  %v436_v9 = vld [vmem:[#allocation2 + $0x1f0] sm:$0xff]  ;;  %v435_v13 = vld [vmem:[#allocation2 + $0x1e8] sm:$0xff]  ;;  %s798_s17 = sshll.u32 %s177_s11, 4  ;;  %s843_s26 = sshll.u32 %s1198_s16, 8 }
  0x27   : > { %s1477_s5 = smov (!%p181_p8, %s799_s5), 3  ;;  %v389_v6 = vld [vmem:[#allocation2 + $0x78] sm:$0xff]  ;;  %882 = vmatprep.subr.mxu1 %v437_v5  ;;  %v388_v10 = vld [vmem:[#allocation2 + $0x70] sm:$0xff]  ;;  %v387_v14 = vld [vmem:[#allocation2 + $0x68] sm:$0xff]  ;;  %s179_s24 = scalar_lea.vmem [#allocation5], %s798_s17 }
  0x28   : > { %s800_s6 = sshll.u32 %s1477_s5, 3  ;;  %v421_v7 = vld [vmem:[#allocation2 + $0x178] sm:$0xff]  ;;  %845 = vmatpush3.msra.mxu0 %v389_v6  ;;  %v420_v11 = vld [vmem:[#allocation2 + $0x170] sm:$0xff]  ;;  %v419_v15 = vld [vmem:[#allocation2 + $0x168] sm:$0xff]  ;;  %s718_s25 = sshll.u32 %s179_s24, 4  ;;  %s1417_s25 = int_to_ptr.vmem [resolvable:$true] %s718_s25 }
  0x29   : > { %s184_s9 = scalar_lea.vmem %s1464_s0, %s800_s6  ;;  %883 = vmatpush3.msra.mxu1 %v421_v7  ;;  %846 = vmatprep.subr.mxu0 %v404_v8  ;;  %v402_v16 = vld [vmem:[#allocation2 + $0xe0] sm:$0xff]  ;;  %v401_v20 = vld [vmem:[#allocation2 + $0xd8] sm:$0xff]  ;;  %v400_v24 = vld [vmem:[#allocation2 + $0xd0] sm:$0xff]  ;;  %s1422_s29 = scalar_lea.hbm %s1467_s3, %s843_s26 }
  0x2a   : > { %v1248_v2 = vld [vmem:[%s184_s9] sm:$0xff]  ;;  %v1251_v3 = vld [vmem:[%s184_s9 + $0x8] sm:$0xff]  ;;  %884 = vmatprep.subr.mxu1 %v436_v9  ;;  %847 = vmatpush3.msra.mxu0 %v388_v10  ;;  %v433_v21 = vld [vmem:[#allocation2 + $0x1d8] sm:$0xff]  ;;  %s1424_s16 = scalar_lea.sflag [#allocation4], %s177_s11  ;;  %s1080_s30 = scalar_lea.vmem %s1417_s25, 256 }
  0x2b   : > { %198 = vrot.lane.b32.xlu0 %v1248_v2, %s1151_s10  ;;  %885 = vmatpush3.msra.mxu1 %v420_v11  ;;  %v434_v17 = vld [vmem:[#allocation2 + $0x1e0] sm:$0xff]  ;;  %v385_v22 = vld [vmem:[#allocation2 + $0x58] sm:$0xff]  ;;  %v432_v25 = vld [vmem:[#allocation2 + $0x1d0] sm:$0xff]  ;;  %v196_v46 = vmul.u32 16, %v1248_v2  ;;  %v197_v47 = vmul.u32 16, %v1251_v3  ;;  %v1152_v11 = vmov 1   ;;  %p1081_p6 = scmp.ne.s32.totalorder %s1417_s25, %s1080_s30 }
  0x2c   : > { %848 = vmatprep.subr.mxu0 %v403_v12  ;;  %886 = vmatprep.subr.mxu1 %v435_v13  ;;  %v386_v18 = vld [vmem:[#allocation2 + $0x60] sm:$0xff]  ;;  %v417_v23 = vld [vmem:[#allocation2 + $0x158] sm:$0xff]  ;;  %v384_v26 = vld [vmem:[#allocation2 + $0x50] sm:$0xff]  ;;  %s1154_s4 = smov [#allocation5]  }
  0x2d   : > { %v418_v19 = vld [vmem:[#allocation2 + $0x160] sm:$0xff]  ;;  %849 = vmatpush3.msra.mxu0 %v387_v14  ;;  %887 = vmatpush3.msra.mxu1 %v419_v15  ;;  %v416_v27 = vld [vmem:[#allocation2 + $0x150] sm:$0xff]  ;;  %v399_v28 = vld [vmem:[#allocation2 + $0xc8] sm:$0xff]  ;;  %v316_v48 = vadd.s32 512, %v196_v46  ;;  %v317_v59 = vadd.s32 512, %v197_v47  ;;  %v258_v63 = vadd.s32 256, %v196_v46  ;;  %p1082_p9 = pnand %p1081_p6, %p1215_p5 }
  0x2e   : > { %850 = vmatprep.subr.mxu0 %v402_v16  ;;  %888 = vmatprep.subr.mxu1 %v434_v17  ;;  %v431_v29 = vld [vmem:[#allocation2 + $0x1c8] sm:$0xff]  ;;  %v398_v32 = vld [vmem:[#allocation2 + $0xc0] sm:$0xff]  ;;  %v397_v36 = vld [vmem:[#allocation2 + $0xb8] sm:$0xff]  ;;  %s1084_s5 = sshll.u32 %s1154_s4, 4  ;;  %s1085_s5 = int_to_ptr.vmem [resolvable:$false] %s1084_s5 }
  0x2f   : > { %200 = vrot.lane.b32.xlu0 %v1251_v3, %s1151_s10  ;;  %851 = vmatpush3.msra.mxu0 %v386_v18  ;;  %v383_v30 = vld [vmem:[#allocation2 + $0x48] sm:$0xff]  ;;  %v430_v33 = vld [vmem:[#allocation2 + $0x1c0] sm:$0xff]  ;;  %v429_v37 = vld [vmem:[#allocation2 + $0x1b8] sm:$0xff]  ;;  %v259_v18 = vadd.s32 256, %v197_v47  ;;  %p1083_p10 = pneg %p1082_p9  ;;  %s1086_s6 = scalar_lea.vmem %s1085_s5, 512 }
  0x30   : > { %889 = vmatpush3.msra.mxu1 %v418_v19  ;;  %852 = vmatprep.subr.mxu0 %v401_v20  ;;  %v415_v31 = vld [vmem:[#allocation2 + $0x148] sm:$0xff]  ;;  %v382_v34 = vld [vmem:[#allocation2 + $0x40] sm:$0xff]  ;;  %v381_v38 = vld [vmem:[#allocation2 + $0x38] sm:$0xff]  ;;  %p1087_p11 = scmp.lt.s32.totalorder %s1417_s25, %s1085_s5  ;;  %p1088_p12 = scmp.lt.s32.totalorder %s1086_s6, %s1080_s30 }
  0x31   : > { %890 = vmatprep.subr.mxu1 %v433_v21  ;;  %853 = vmatpush3.msra.mxu0 %v385_v22  ;;  %v414_v35 = vld [vmem:[#allocation2 + $0x140] sm:$0xff]  ;;  %v413_v39 = vld [vmem:[#allocation2 + $0x138] sm:$0xff]  ;;  %v396_v40 = vld [vmem:[#allocation2 + $0xb0] sm:$0xff]  ;;  %v189_v21 = vlaneseq }
  0x32   : > { %891 = vmatpush3.msra.mxu1 %v417_v23  ;;  %854 = vmatprep.subr.mxu0 %v400_v24  ;;  %v428_v41 = vld [vmem:[#allocation2 + $0x1b0] sm:$0xff]  ;;  %v395_v44 = vld [vmem:[#allocation2 + $0xa8] sm:$0xff]  ;;  %v394_v51 = vld [vmem:[#allocation2 + $0xa0] sm:$0xff]  ;;  %p1089_p13 = por %p1088_p12, %p1087_p11 }
  0x33   : > { %892 = vmatprep.subr.mxu1 %v432_v25  ;;  %855 = vmatpush3.msra.mxu0 %v384_v26  ;;  %v380_v42 = vld [vmem:[#allocation2 + $0x30] sm:$0xff]  ;;  %v427_v45 = vld [vmem:[#allocation2 + $0x1a8] sm:$0xff]  ;;  %v426_v52 = vld [vmem:[#allocation2 + $0x1a0] sm:$0xff]  ;;  %v1257_v22 = vand.u32 127, %v189_v21 }
  0x34   : > { %893 = vmatpush3.msra.mxu1 %v416_v27  ;;  %856 = vmatprep.subr.mxu0 %v399_v28  ;;  %v412_v43 = vld [vmem:[#allocation2 + $0x130] sm:$0xff]  ;;  %v379_v49 = vld [vmem:[#allocation2 + $0x28] sm:$0xff]  ;;  %v378_v54 = vld [vmem:[#allocation2 + $0x20] sm:$0xff]  ;;  %v1153_v28 = vmov 0.0   ;;  %p1090_p0 = pnand %p1089_p13, %p1083_p10 }
  0x35   : > { %894 = vmatprep.subr.mxu1 %v431_v29  ;;  %857 = vmatpush3.msra.mxu0 %v383_v30  ;;  %v411_v50 = vld [vmem:[#allocation2 + $0x128] sm:$0xff]  ;;  %v410_v55 = vld [vmem:[#allocation2 + $0x120] sm:$0xff]  ;;  %v393_v56 = vld [vmem:[#allocation2 + $0x98] sm:$0xff]  ;;  %v1260_v23 = vadd.s32 128, %v1257_v22  ;;  %v1263_v24 = vadd.s32 384, %v1257_v22 }
  0x36   : > { %895 = vmatpush3.msra.mxu1 %v415_v31  ;;  %858 = vmatprep.subr.mxu0 %v398_v32  ;;  %v425_v60 = vld [vmem:[#allocation2 + $0x198] sm:$0xff]  ;;  %v392_v0 = vld [vmem:[#allocation2 + $0x90] sm:$0xff]  ;;  %v391_v7 = vld [vmem:[#allocation2 + $0x88] sm:$0xff] }
  0x37   : > { %896 = vmatprep.subr.mxu1 %v430_v33  ;;  %859 = vmatpush3.msra.mxu0 %v382_v34  ;;  %v377_v61 = vld [vmem:[#allocation2 + $0x18] sm:$0xff]  ;;  %v424_v2 = vld [vmem:[#allocation2 + $0x190] sm:$0xff]  ;;  %v423_v9 = vld [vmem:[#allocation2 + $0x188] sm:$0xff] }
  0x38   : > { %897 = vmatpush3.msra.mxu1 %v414_v35  ;;  %860 = vmatprep.subr.mxu0 %v397_v36  ;;  %v409_v62 = vld [vmem:[#allocation2 + $0x118] sm:$0xff]  ;;  %v376_v4 = vld [vmem:[#allocation2 + $0x10] sm:$0xff]  ;;  %v375_v10 = vld [vmem:[#allocation2 + $0x8] sm:$0xff] }
  0x39   : > { %898 = vmatprep.subr.mxu1 %v429_v37  ;;  %861 = vmatpush3.msra.mxu0 %v381_v38  ;;  %v408_v5 = vld [vmem:[#allocation2 + $0x110] sm:$0xff]  ;;  %v407_v12 = vld [vmem:[#allocation2 + $0x108] sm:$0xff]  ;;  %v390_v13 = vld [vmem:[#allocation2 + $0x80] sm:$0xff] }
  0x3a   : > { %899 = vmatpush3.msra.mxu1 %v413_v39  ;;  %862 = vmatprep.subr.mxu0 %v396_v40  ;;  %v422_v14 = vld [vmem:[#allocation2 + $0x180] sm:$0xff]  ;;  %v469_v19 = vld [vmem:[#allocation2 + $0x2f8] sm:$0xff] }
  0x3b   : > { %900 = vmatprep.subr.mxu1 %v428_v41  ;;  %863 = vmatpush3.msra.mxu0 %v380_v42  ;;  %v374_v15 = vld [vmem:[#allocation2] sm:$0xff] }
  0x3c   : > { %901 = vmatpush3.msra.mxu1 %v412_v43  ;;  %864 = vmatprep.subr.mxu0 %v395_v44  ;;  %v406_v17 = vld [vmem:[#allocation2 + $0x100] sm:$0xff] }
  0x3d   : > { %902 = vmatprep.subr.mxu1 %v427_v45  ;;  %865 = vmatpush3.msra.mxu0 %v379_v49  ;;  %v453_v49 = vld [vmem:[#allocation2 + $0x278] sm:$0xff] }
  0x3e   : > { %903 = vmatpush3.msra.mxu1 %v411_v50  ;;  %866 = vmatprep.subr.mxu0 %v394_v51  ;;  %v468_v51 = vld [vmem:[#allocation2 + $0x2f0] sm:$0xff] }
  0x3f   : > { %904 = vmatprep.subr.mxu1 %v426_v52  ;;  %867 = vmatpush3.msra.mxu0 %v378_v54  ;;  %v467_v54 = vld [vmem:[#allocation2 + $0x2e8] sm:$0xff] }
  0x40   : > { %905 = vmatpush3.msra.mxu1 %v410_v55  ;;  %868 = vmatprep.subr.mxu0 %v393_v56  ;;  %v1328_v56 = vadd.s32 640, %v1257_v22 }
  0x41   : > { %906 = vmatprep.subr.mxu1 %v425_v60  ;;  %869 = vmatpush3.msra.mxu0 %v377_v61 }
  0x42   : > { %907 = vmatpush3.msra.mxu1 %v409_v62  ;;  %870 = vmatprep.subr.mxu0 %v392_v0  ;;  %v466_v62 = vld [vmem:[#allocation2 + $0x2e0] sm:$0xff] }
  0x43   : > { %908 = vmatprep.subr.mxu1 %v424_v2  ;;  %871 = vmatpush3.msra.mxu0 %v376_v4  ;;  %v450_v0 = vld [vmem:[#allocation2 + $0x260] sm:$0xff] }
  0x44   : > { %909 = vmatpush3.msra.mxu1 %v408_v5  ;;  %872 = vmatprep.subr.mxu0 %v391_v7  ;;  %v465_v5 = vld [vmem:[#allocation2 + $0x2d8] sm:$0xff] }
  0x45   : > { %910 = vmatprep.subr.mxu1 %v423_v9  ;;  %873 = vmatpush3.msra.mxu0 %v375_v10  ;;  %v449_v9 = vld [vmem:[#allocation2 + $0x258] sm:$0xff] }
  0x46   : > { %911 = vmatpush3.msra.mxu1 %v407_v12  ;;  %874 = vmatprep.subr.mxu0 %v390_v13 }
  0x47   : > { %912 = vmatprep.subr.mxu1 %v422_v14  ;;  %875 = vmatpush3.msra.mxu0 %v374_v15 }
  0x48   : > { %913 = vmatpush3.msra.mxu1 %v406_v17  ;;  %920 = vmatprep.subr.mxu0 %v469_v19 }
  0x49   : > { %958 = vmatprep.subr.mxu1 %v469_v19  ;;  %v464_v19 = vld [vmem:[#allocation2 + $0x2d0] sm:$0xff] }
  0x9d   : > { %v199_v53 = vpop.permute.xlu0 %198 }
  0x9e   : > { %v318_v57 = vadd.s32 %v316_v48, %v199_v53  ;;  %v202_v58 = vadd.s32 %v199_v53, %v196_v46  ;;  %v260_v8 = vadd.s32 %v258_v63, %v199_v53  ;;  %v452_v53 = vld [vmem:[#allocation2 + $0x270] sm:$0xff] }
  0xa0   : > { %321 = vperm.xlu0 %1051, %v318_v57   ;;  %205 = vperm.xlu1 %1049, %v202_v58   ;;  %v451_v58 = vld [vmem:[#allocation2 + $0x268] sm:$0xff] }
  0xa1   : > { %v201_v3 = vpop.permute.xlu0 %200 }
  0xa2   : > { %v319_v6 = vadd.s32 %v317_v59, %v201_v3  ;;  %v203_v16 = vadd.s32 %v201_v3, %v197_v47  ;;  %v261_v20 = vadd.s32 %v259_v18, %v201_v3 }
  0xa4   : > { %1050 = vset.pattern.permute.xlu1 %v1152_v11  ;;  %324 = vperm.xlu0 %1051, %v319_v6  }
  0xa5   : > { %263 = vperm.xlu1 %1050, %v260_v8  }
  0xa9   : > { %1052 = vset.pattern.permute.xlu1 %v1150_v1  ;;  %v1278_v1 = vadd.s32 256, %v1257_v22 }
  0xaa   : > { %208 = vperm.xlu1 %1052, %v203_v16  }
  0xae   : > { %1053 = vset.pattern.permute.xlu1 %v1152_v11 }
  0xaf   : > { %266 = vperm.xlu1 %1053, %v261_v20  }
 0x11b   : > { %v1265_v25 = vpop.permute.xlu0 %321  ;;  %v1267_v26 = vpop.permute.xlu1 %205 }
 0x11c   : > { %vm211_vm0 = vcmp.eq.s32.totalorder %v1260_v23, %v1267_v26  ;;  %vm327_vm1 = vcmp.eq.s32.totalorder %v1260_v23, %v1265_v25  ;;  %vm213_vm2 = vcmp.eq.s32.totalorder %v1263_v24, %v1267_v26  ;;  %vm329_vm3 = vcmp.eq.s32.totalorder %v1263_v24, %v1265_v25 }
 0x11d   : > { %v802_v29 = vsel %vm211_vm0, 1.0, %v1153_v28  ;;  %v826_v30 = vsel %vm327_vm1, 1.0, %v1153_v28  ;;  %vm210_vm4 = vcmp.eq.s32.totalorder %v1257_v22, %v1267_v26  ;;  %vm326_vm5 = vcmp.eq.s32.totalorder %v1257_v22, %v1265_v25 }
 0x11e   : > { %v804_v31 = vsel %vm213_vm2, 1.0, %v1153_v28  ;;  %v828_v32 = vsel %vm329_vm3, 1.0, %v1153_v28  ;;  %vm212_vm9 = vcmp.eq.s32.totalorder %v1278_v1, %v1267_v26  ;;  %v801_v38 = vsel %vm210_vm4, 1.0, %v1153_v28 }
 0x11f   : > { %v1300_v35 = vpop.permute.xlu0 %324  ;;  %v825_v41 = vsel %vm326_vm5, 1.0, %v1153_v28  ;;  %vm328_vm11 = vcmp.eq.s32.totalorder %v1278_v1, %v1265_v25  ;;  %v803_v45 = vsel %vm212_vm9, 1.0, %v1153_v28 }
 0x120   : > { %v1280_v27 = vpop.permute.xlu1 %263  ;;  %vm333_vm12 = vcmp.eq.s32.totalorder %v1260_v23, %v1300_v35  ;;  %v827_v50 = vsel %vm328_vm11, 1.0, %v1153_v28  ;;  %vm335_vm15 = vcmp.eq.s32.totalorder %v1263_v24, %v1300_v35  ;;  %vm332_vm2 = vcmp.eq.s32.totalorder %v1257_v22, %v1300_v35 }
 0x121   : > { %vm269_vm6 = vcmp.eq.s32.totalorder %v1260_v23, %v1280_v27  ;;  %vm271_vm7 = vcmp.eq.s32.totalorder %v1263_v24, %v1280_v27  ;;  %vm268_vm8 = vcmp.eq.s32.totalorder %v1257_v22, %v1280_v27  ;;  %vm270_vm10 = vcmp.eq.s32.totalorder %v1278_v1, %v1280_v27 }
 0x122   : > { %v814_v33 = vsel %vm269_vm6, 1.0, %v1153_v28  ;;  %v816_v34 = vsel %vm271_vm7, 1.0, %v1153_v28  ;;  %v813_v39 = vsel %vm268_vm8, 1.0, %v1153_v28  ;;  %v815_v46 = vsel %vm270_vm10, 1.0, %v1153_v28 }
 0x123   : > { %v305_v36 = vadd.f32 %v814_v33, %v802_v29  ;;  %v307_v37 = vadd.f32 %v816_v34, %v804_v31  ;;  %v304_v40 = vadd.f32 %v813_v39, %v801_v38  ;;  %v306_v48 = vadd.f32 %v815_v46, %v803_v45  ;;  %v463_v31 = vld [vmem:[#allocation2 + $0x2c8] sm:$0xff]  ;;  %v462_v38 = vld [vmem:[#allocation2 + $0x2c0] sm:$0xff] }
 0x124   : > { %v832_v55 = vsel %vm333_vm12, 1.0, %v1153_v28  ;;  %v834_v61 = vsel %vm335_vm15, 1.0, %v1153_v28  ;;  %vm334_vm5 = vcmp.eq.s32.totalorder %v1278_v1, %v1300_v35  ;;  %vm215_vm7 = vcmp.eq.s32.totalorder %v1328_v56, %v1267_v26  ;;  %v446_v39 = vld [vmem:[#allocation2 + $0x240] sm:$0xff]  ;;  %v459_v45 = vld [vmem:[#allocation2 + $0x2a8] sm:$0xff] }
 0x125   : > { %v1309_v42 = vpop.permute.xlu1 %208  ;;  %v363_v43 = vadd.f32 %v826_v30, %v305_v36  ;;  %v365_v44 = vadd.f32 %v828_v32, %v307_v37  ;;  %v362_v47 = vadd.f32 %v825_v41, %v304_v40  ;;  %v364_v52 = vadd.f32 %v827_v50, %v306_v48  ;;  %v447_v37 = vld [vmem:[#allocation2 + $0x248] sm:$0xff]  ;;  %v461_v40 = vld [vmem:[#allocation2 + $0x2b8] sm:$0xff]  ;;  %v458_v48 = vld [vmem:[#allocation2 + $0x2a0] sm:$0xff] }
 0x126   : > { %vm217_vm13 = vcmp.eq.s32.totalorder %v1260_v23, %v1309_v42  ;;  %vm219_vm14 = vcmp.eq.s32.totalorder %v1263_v24, %v1309_v42  ;;  %vm216_vm0 = vcmp.eq.s32.totalorder %v1257_v22, %v1309_v42  ;;  %vm218_vm1 = vcmp.eq.s32.totalorder %v1278_v1, %v1309_v42  ;;  %v445_v41 = vld [vmem:[#allocation2 + $0x238] sm:$0xff] }
 0x127   : > { %541 = vmatprep.mubr.f32.mxu0 %v363_v43  ;;  %616 = vmatprep.mubr.f32.mxu1 %v365_v44  ;;  %v808_v59 = vsel %vm217_vm13, 1.0, %v1153_v28  ;;  %v810_v60 = vsel %vm219_vm14, 1.0, %v1153_v28  ;;  %v807_v63 = vsel %vm216_vm0, 1.0, %v1153_v28  ;;  %v809_v4 = vsel %vm218_vm1, 1.0, %v1153_v28  ;;  %v460_v43 = vld [vmem:[#allocation2 + $0x2b0] sm:$0xff]  ;;  %v457_v50 = vld [vmem:[#allocation2 + $0x298] sm:$0xff] }
 0x128   : > { %542 = vmatmul.mubr.f32.vlgmr.msra.gmra.mxu0 %v362_v47  ;;  %617 = vmatmul.mubr.f32.vlgmr.msra.gmra.mxu1 %v364_v52  ;;  %v831_v11 = vsel %vm332_vm2, 1.0, %v1153_v28  ;;  %vm273_vm9 = vcmp.eq.s32.totalorder %v1328_v56, %v1280_v27  ;;  %v806_v18 = vsel %vm215_vm7, 1.0, %v1153_v28  ;;  %v833_v20 = vsel %vm334_vm5, 1.0, %v1153_v28  ;;  %v444_v44 = vld [vmem:[#allocation2 + $0x230] sm:$0xff]  ;;  %v443_v47 = vld [vmem:[#allocation2 + $0x228] sm:$0xff] }
 0x129   : > { %921 = vmatpush3.msra.mxu0 %v453_v49  ;;  %974 = vmatpush3.msra.mxu1 %v453_v49  ;;  %v818_v15 = vsel %vm273_vm9, 1.0, %v1153_v28  ;;  %vm221_vm10 = vcmp.eq.s32.totalorder %v1328_v56, %v1309_v42  ;;  %vm331_vm12 = vcmp.eq.s32.totalorder %v1328_v56, %v1265_v25  ;;  %vm337_vm13 = vcmp.eq.s32.totalorder %v1328_v56, %v1300_v35  ;;  %v442_v49 = vld [vmem:[#allocation2 + $0x220] sm:$0xff] }
 0x12a   : > { %922 = vmatprep.subr.mxu0 %v468_v51  ;;  %v1330_v57 = vpop.permute.xlu1 %266  ;;  %959 = vmatprep.subr.mxu1 %v468_v51  ;;  %v309_v21 = vadd.f32 %v818_v15, %v806_v18  ;;  %v830_v32 = vsel %vm331_vm12, 1.0, %v1153_v28  ;;  %v836_v33 = vsel %vm337_vm13, 1.0, %v1153_v28  ;;  %v194_v46 = vadd.s32 512, %v1257_v22 }
 0x12b   : > { %923 = vmatpush3.msra.mxu0 %v452_v53  ;;  %vm275_vm3 = vcmp.eq.s32.totalorder %v1260_v23, %v1330_v57  ;;  %vm277_vm4 = vcmp.eq.s32.totalorder %v1263_v24, %v1330_v57  ;;  %vm274_vm6 = vcmp.eq.s32.totalorder %v1257_v22, %v1330_v57  ;;  %975 = vmatpush3.msra.mxu1 %v452_v53  ;;  %v812_v24 = vsel %vm221_vm10, 1.0, %v1153_v28  ;;  %v441_v22 = vld [vmem:[#allocation2 + $0x218] sm:$0xff]  ;;  %v440_v53 = vld [vmem:[#allocation2 + $0x210] sm:$0xff] }
 0x12c   : > { %924 = vmatprep.subr.mxu0 %v467_v54  ;;  %v820_v2 = vsel %vm275_vm3, 1.0, %v1153_v28  ;;  %v822_v3 = vsel %vm277_vm4, 1.0, %v1153_v28  ;;  %v819_v8 = vsel %vm274_vm6, 1.0, %v1153_v28  ;;  %960 = vmatprep.subr.mxu1 %v467_v54  ;;  %vm276_vm8 = vcmp.eq.s32.totalorder %v1278_v1, %v1330_v57  ;;  %v448_v1 = vld [vmem:[#allocation2 + $0x250] sm:$0xff] }
 0x12d   : > { %925 = vmatpush3.msra.mxu0 %v451_v58  ;;  %v311_v6 = vadd.f32 %v820_v2, %v808_v59  ;;  %v313_v7 = vadd.f32 %v822_v3, %v810_v60  ;;  %v310_v10 = vadd.f32 %v819_v8, %v807_v63  ;;  %976 = vmatpush3.msra.mxu1 %v451_v58  ;;  %v821_v14 = vsel %vm276_vm8, 1.0, %v1153_v28  ;;  %v454_v58 = vld [vmem:[#allocation2 + $0x280] sm:$0xff] }
 0x12e   : > { %926 = vmatprep.subr.mxu0 %v466_v62  ;;  %961 = vmatprep.subr.mxu1 %v466_v62  ;;  %v312_v17 = vadd.f32 %v821_v14, %v809_v4  ;;  %vm279_vm11 = vcmp.eq.s32.totalorder %v1328_v56, %v1330_v57  ;;  %v367_v34 = vadd.f32 %v830_v32, %v309_v21  ;;  %v438_v59 = vld [vmem:[#allocation2 + $0x200] sm:$0xff] }
 0x12f   : > { %927 = vmatpush3.msra.mxu0 %v450_v0  ;;  %v369_v12 = vadd.f32 %v832_v55, %v311_v6  ;;  %v371_v13 = vadd.f32 %v834_v61, %v313_v7  ;;  %v368_v16 = vadd.f32 %v831_v11, %v310_v10  ;;  %977 = vmatpush3.msra.mxu1 %v450_v0  ;;  %v824_v29 = vsel %vm279_vm11, 1.0, %v1153_v28  ;;  %v837_v7 = vld [vmem:[%s1466_s2] ss:$0 sm:$0xff] }
 0x130   : > { %928 = vmatprep.subr.mxu0 %v465_v5  ;;  %962 = vmatprep.subr.mxu1 %v465_v5  ;;  %v370_v23 = vadd.f32 %v833_v20, %v312_v17  ;;  %v315_v30 = vadd.f32 %v824_v29, %v812_v24  ;;  %vm272_vm14 = vcmp.eq.s32.totalorder %v194_v46, %v1280_v27 }
 0x131   : > { %929 = vmatpush3.msra.mxu0 %v449_v9  ;;  %546 = vmatprep.mubr.f32.mxu0 %v369_v12  ;;  %vm220_vm15 = vcmp.eq.s32.totalorder %v194_v46, %v1309_v42  ;;  %vm278_vm0 = vcmp.eq.s32.totalorder %v194_v46, %v1330_v57  ;;  %vm214_vm1 = vcmp.eq.s32.totalorder %v194_v46, %v1267_v26  ;;  %v817_v51 = vsel %vm272_vm14, 1.0, %v1153_v28  ;;  %v456_v42 = vld [vmem:[#allocation2 + $0x290] sm:$0xff]  ;;  %v455_v26 = vld [vmem:[#allocation2 + $0x288] sm:$0xff] }
 0x132   : > { %978 = vmatpush3.msra.mxu1 %v449_v9  ;;  %621 = vmatprep.mubr.f32.mxu1 %v371_v13  ;;  %v373_v36 = vadd.f32 %v836_v33, %v315_v30  ;;  %v811_v52 = vsel %vm220_vm15, 1.0, %v1153_v28  ;;  %v823_v27 = vsel %vm278_vm0, 1.0, %v1153_v28  ;;  %vm330_vm2 = vcmp.eq.s32.totalorder %v194_v46, %v1265_v25  ;;  %v439_v57 = vld [vmem:[#allocation2 + $0x208] sm:$0xff] }
 0x133   : > { %930 = vmatprep.subr.mxu0 %v464_v19  ;;  %963 = vmatprep.subr.mxu1 %v464_v19  ;;  %v805_v54 = vsel %vm214_vm1, 1.0, %v1153_v28  ;;  %vm336_vm3 = vcmp.eq.s32.totalorder %v194_v46, %v1300_v35  ;;  %v314_v56 = vadd.f32 %v823_v27, %v811_v52  ;;  %v829_v60 = vsel %vm330_vm2, 1.0, %v1153_v28 }
 0x134   : > { %547 = vmatmul.mubr.f32.gmra.mxu0 %v368_v16  ;;  %622 = vmatmul.mubr.f32.gmra.mxu1 %v370_v23  ;;  %v308_v55 = vadd.f32 %v817_v51, %v805_v54  ;;  %v835_v61 = vsel %vm336_vm3, 1.0, %v1153_v28 }
 0x135   : > { %931 = vmatpush3.msra.mxu0 %v448_v1  ;;  %979 = vmatpush3.msra.mxu1 %v448_v1  ;;  %v372_v62 = vadd.f32 %v835_v61, %v314_v56 }
 0x136   : > { %932 = vmatprep.subr.mxu0 %v463_v31  ;;  %964 = vmatprep.subr.mxu1 %v463_v31  ;;  %v366_v35 = vadd.f32 %v829_v60, %v308_v55 }
 0x137   : > { %691 = vmatprep.mubr.f32.mxu0 %v367_v34  ;;  %696 = vmatprep.mubr.f32.mxu1 %v373_v36 }
 0x138   : > { %933 = vmatpush3.msra.mxu0 %v447_v37  ;;  %980 = vmatpush3.msra.mxu1 %v447_v37 }
 0x139   : > { %934 = vmatprep.subr.mxu0 %v462_v38  ;;  %965 = vmatprep.subr.mxu1 %v462_v38 }
 0x13a   : > { %935 = vmatpush3.msra.mxu0 %v446_v39  ;;  %981 = vmatpush3.msra.mxu1 %v446_v39 }
 0x13b   : > { %936 = vmatprep.subr.mxu0 %v461_v40  ;;  %966 = vmatprep.subr.mxu1 %v461_v40 }
 0x13c   : > { %937 = vmatpush3.msra.mxu0 %v445_v41  ;;  %982 = vmatpush3.msra.mxu1 %v445_v41 }
 0x13d   : > { %938 = vmatprep.subr.mxu0 %v460_v43  ;;  %967 = vmatprep.subr.mxu1 %v460_v43 }
 0x13e   : > { %939 = vmatpush3.msra.mxu0 %v444_v44  ;;  %983 = vmatpush3.msra.mxu1 %v444_v44 }
 0x13f   : > { %940 = vmatprep.subr.mxu0 %v459_v45  ;;  %968 = vmatprep.subr.mxu1 %v459_v45 }
 0x140   : > { %941 = vmatpush3.msra.mxu0 %v443_v47  ;;  %984 = vmatpush3.msra.mxu1 %v443_v47 }
 0x141   : > { %942 = vmatprep.subr.mxu0 %v458_v48  ;;  %969 = vmatprep.subr.mxu1 %v458_v48 }
 0x142   : > { %943 = vmatpush3.msra.mxu0 %v442_v49  ;;  %985 = vmatpush3.msra.mxu1 %v442_v49 }
 0x143   : > { %944 = vmatprep.subr.mxu0 %v457_v50  ;;  %970 = vmatprep.subr.mxu1 %v457_v50 }
 0x144   : > { %945 = vmatpush3.msra.mxu0 %v441_v22  ;;  %986 = vmatpush3.msra.mxu1 %v441_v22 }
 0x145   : > { %946 = vmatprep.subr.mxu0 %v456_v42  ;;  %971 = vmatprep.subr.mxu1 %v456_v42 }
 0x146   : > { %947 = vmatpush3.msra.mxu0 %v440_v53  ;;  %987 = vmatpush3.msra.mxu1 %v440_v53 }
 0x147   : > { %948 = vmatprep.subr.mxu0 %v455_v26  ;;  %972 = vmatprep.subr.mxu1 %v455_v26 }
 0x148   : > { %949 = vmatpush3.msra.mxu0 %v439_v57  ;;  %988 = vmatpush3.msra.mxu1 %v439_v57 }
 0x149   : > { %950 = vmatprep.subr.mxu0 %v454_v58  ;;  %973 = vmatprep.subr.mxu1 %v454_v58 }
 0x14a   : > { %951 = vmatpush3.msra.mxu0 %v438_v59  ;;  %989 = vmatpush3.msra.mxu1 %v438_v59 }
 0x14b   : > { %692 = vmatmul.mubr.f32.vlgmr.msra.gmra.mxu0 %v366_v35  ;;  %697 = vmatmul.mubr.f32.vlgmr.msra.gmra.mxu1 %v372_v62 }
 0x1e8   : > { %v876_v63 = vpop.f32.mrf.mxu0  ;;  %v914_v2 = vpop.f32.mrf.mxu1 }
 0x1ea   : > { %v877_v0 = vpop.f32.mrf.mxu0  ;;  %v915_v4 = vpop.f32.mrf.mxu1 }
 0x1eb   : > { %v878_v5 = vadd.f32 %v877_v0, %v876_v63  ;;  %v916_v13 = vadd.f32 %v915_v4, %v914_v2 }
 0x1ed   : > { %v544_v9 = vadd.f32 %v878_v5, %v837_v7 }
 0x1ef   : > { %v619_v17 = vadd.f32 %v916_v13, %v544_v9 }
 0x1f4   : > { %v879_v3 = vpop.f32.mrf.mxu0  ;;  %v917_v28 = vpop.f32.mrf.mxu1 }
 0x1f6   : > { %v880_v25 = vpop.f32.mrf.mxu0  ;;  %v918_v8 = vpop.f32.mrf.mxu1 }
 0x1f7   : > { %v881_v6 = vadd.f32 %v880_v25, %v879_v3  ;;  %v919_v14 = vadd.f32 %v918_v8, %v917_v28 }
 0x1f9   : > { %v549_v10 = vadd.f32 %v881_v6, %v837_v7 }
 0x1fb   : > { %v624_v18 = vadd.f32 %v919_v14, %v549_v10 }
 0x20b   : > { %v952_v11 = vpop.f32.mrf.mxu0  ;;  %v955_v12 = vpop.f32.mrf.mxu1 }
 0x20d   : > { %v953_v15 = vpop.f32.mrf.mxu0  ;;  %v956_v16 = vpop.f32.mrf.mxu1 }
 0x20e   : > { %v954_v19 = vadd.f32 %v953_v15, %v952_v11  ;;  %v957_v20 = vadd.f32 %v956_v16, %v955_v12 }
 0x210   : > { %v694_v21 = vadd.f32 %v954_v19, %v619_v17  ;;  %v699_v23 = vadd.f32 %v957_v20, %v624_v18 }
 0x212   : > { %702 = vst [vmem:[%s179_s24] sm:$0xff] %v694_v21  ;;  %703 = vst [vmem:[%s179_s24 + $0x8] sm:$0xff] %v699_v23 }
 0x213   : > { %1093 = shalt.err (!%p1090_p0)
}
 0x214   : > { %s1094_s7 = scalar_lea.hbm %s1422_s29, 256  ;;  %s1098_s10 = scalar_lea.hbm %s1467_s3, 512 }
 0x215   : > { %p1095_p1 = scmp.ne.s32.totalorder %s1422_s29, %s1094_s7  ;;  %p1099_p4 = scmp.lt.s32.totalorder %s1422_s29, %s1467_s3 }
 0x216   : > { %p1100_p7 = scmp.lt.s32.totalorder %s1098_s10, %s1094_s7 }
 0x217   : > { %p1096_p2 = pnand %p1095_p1, %p1215_p5 }
 0x218   : > { %p1101_p8 = por %p1100_p7, %p1099_p4 }
 0x219   : > { %p1097_p3 = pneg %p1096_p2 }
 0x21b   : > { %p1102_p6 = pnand %p1101_p8, %p1097_p3 }
 0x21d   : > { %1105 = shalt.err (!%p1102_p6)
}
 0x21e   : > { %s1155_s19 = smov 128   ;;  %s1156_s20 = smov 8  }
 0x21f   : > { %994 = dma.vmem_to_hbm [thread:$0]  (%p1215_p5), %s1417_s25, 256, %s1422_s29, %s1424_s16, %s1155_s19, %s1155_s19, %s1156_s20  }
 0x220 PF: > { %p1006_p9 = scmp.ge.s32.totalorder %s1144_s15, 2  ;;  %s733_s24 = sand.u32 1, %s1132_s12  }
 0x221   : > { %p1471_p10 = scmp.ne.s32.totalorder %s1469_s23, 0  ;;  %s734_s26 = scalar_lea.sflag [#allocation4], %s733_s24 }
 0x223   : > { %p1001_p11 = pnand %p1006_p9, %p1471_p10 }
 0x225   : > { %p1002_p12 = pneg %p1001_p11 }
 0x227   : > { %1127 = dma.done.wait (%p1002_p12), %s734_s26, 256  }
 0x228   : > { %1129 = vsyncadd (%p1002_p12), %s734_s26, 4294967040  ;;  %p14_p13 = scmp.ge.s32.totalorder %s1202_s18, 4   ;;  %s1472_s12 = smov %s1136_s13 }
 0x229   : > { %s1473_s13 = smov %s1140_s14  ;;  %s1474_s14 = smov %s1213_s21 }
 0x22a   : > { %s1475_s15 = smov %s1202_s18  ;;  %16 = sbr.rel (!%p14_p13) target bundleno = 4 (0x4), region = 72 }
 0x22f   :  { %739 = vsyncpa [#allocation3], 1 }
 0x230   :  { %741 = vsyncpa [#allocation3 + $0x1], 1 }
 0x231   :  { %742 = vsyncpa [#allocation4], 1 }
 0x232   :  { %744 = vsyncpa [#allocation4 + $0x1], 1 }

</bundles_post_ra>
